<compile_context>
chip_gen: v5e
topology: v5e:2x2
jax: 0.10.0
libtpu: 0.0.40
codegen_flags: <defaults>
</compile_context>

<pallas_src>
import functools

import jax
import jax.numpy as jnp
from jax.experimental import pallas as pl
from jax.experimental.pallas import tpu as pltpu


def _round_up(n, m):
    return ((n + m - 1) // m) * m


def _choose_tile_m(m):
    """Row-tile size heuristic (overridable via tile_m=...).

    * small m: 128-row tiles -> >=2 grid steps at m>128 so v7x's two
      TensorCores both get work; on v5e/v6e the extra steps cost only
      ~0.35 us each (weights are already resident, nothing to overlap).
    * large m: 512-row tiles for HBM-streaming efficiency.
    """
    m_pad = _round_up(max(m, 1), 128)
    return 128 if m_pad <= 1024 else 512


def meta_mlp_kernel(x_ref, w1_ref, b1_ref, w2_ref, b2_ref, o_ref):
    # hidden = relu(x @ W1 + b1); f32 operands, f32 accumulation.
    h = jnp.dot(x_ref[...], w1_ref[...], preferred_element_type=jnp.float32)
    h = jnp.maximum(h + b1_ref[...], 0.0)
    # out = hidden @ W2 + b2
    y = jnp.dot(h, w2_ref[...], preferred_element_type=jnp.float32)
    o_ref[...] = (y + b2_ref[...]).astype(o_ref.dtype)


def prepare_weights(w1, b1, w2, b2):
    """One-time weight prep (init / after adapt): reshape biases to (1, n).

    Weights stay in f32 and unpadded: every weight/bias BlockSpec uses its
    full array dims (always legal), and at these sizes the kernel is
    DMA/overhead-bound so bf16 operands buy nothing.
    """
    in_dim, hidden = w1.shape
    hidden2, out_dim = w2.shape
    assert hidden2 == hidden, "W1/W2 hidden dims must match"
    return (w1, b1.reshape(1, hidden), w2, b2.reshape(1, out_dim))


def meta_model_forward(x, params, *, tile_m=None):
    """MetaModel.forward(x) == base_model(x) for the 2-layer MLP base model.

    x may be (..., in_dim); all leading dims (tasks, batch, ...) are
    flattened into one row axis so many MAML tasks/samples share one
    pallas_call with VMEM-resident weights.  `params` comes from
    prepare_weights() (hoisted out of the per-forward path).
    """
    w1, b1, w2, b2 = params
    *lead, in_dim = x.shape
    hidden = w1.shape[1]
    out_dim = w2.shape[1]
    assert w1.shape[0] == in_dim

    x2 = x.reshape(-1, in_dim)
    m = x2.shape[0]

    if tile_m is None:
        tile_m = _choose_tile_m(m)
    m_pad = _round_up(max(m, 1), tile_m)

    # Only per-call padding left: rows up to a multiple of tile_m.
    if m_pad != m:
        x2 = jnp.pad(x2, ((0, m_pad - m), (0, 0)))

    grid = (m_pad // tile_m,)

    # Weights/biases: block index never changes -> DMA'd once, reused across
    # all grid steps (resident in VMEM).
    resident = lambda shape: pl.BlockSpec(shape, lambda i: (0, 0))

    itemsize = jnp.dtype(x.dtype).itemsize
    cost = pl.CostEstimate(
        flops=2 * m_pad * (in_dim * hidden + hidden * out_dim),
        transcendentals=0,
        bytes_accessed=itemsize * (m_pad * in_dim            # x read
                                   + in_dim * hidden + hidden  # W1, b1
                                   + hidden * out_dim + out_dim  # W2, b2
                                   + m_pad * out_dim),        # out write
    )

    out_padded = pl.pallas_call(
        meta_mlp_kernel,
        out_shape=jax.ShapeDtypeStruct((m_pad, out_dim), x.dtype),
        grid=grid,
        in_specs=[
            pl.BlockSpec((tile_m, in_dim), lambda i: (i, 0)),   # activations
            resident((in_dim, hidden)),                         # W1
            resident((1, hidden)),                              # b1
            resident((hidden, out_dim)),                        # W2
            resident((1, out_dim)),                             # b2
        ],
        out_specs=pl.BlockSpec((tile_m, out_dim), lambda i: (i, 0)),
        compiler_params=pltpu.CompilerParams(
            dimension_semantics=("parallel",)),  # v7x: grid split across 2 TCs
        cost_estimate=cost,
    )(x2, w1, b1, w2, b2)

    return out_padded[:m].reshape(*lead, out_dim)


def reference_forward(x, w1, b1, w2, b2):
    """Pure-f32 reference (what the PyTorch module computes)."""
    h = jnp.maximum(
        jnp.dot(x, w1, precision=jax.lax.Precision.HIGHEST) + b1.reshape(1, -1),
        0.0)
    return (jnp.dot(h, w2, precision=jax.lax.Precision.HIGHEST)
            + b2.reshape(1, -1))


if __name__ == "__main__":
    key = jax.random.PRNGKey(0)
    k_x, k_w1, k_b1, k_w2, k_b2 = jax.random.split(key, 5)

    # Multi-task MAML batch: (tasks, batch, in_dim); weights shared (one
    # base_model).  250 total rows -> padded to 256 -> 2 grid steps of 128.
    tasks, batch, in_dim, hidden, out_dim = 5, 50, 32, 64, 16

    x = jax.random.normal(k_x, (tasks, batch, in_dim), dtype=jnp.float32)
    # Deterministic "base_model" parameter init (synthetic, not a checkpoint).
    w1 = jax.random.normal(k_w1, (in_dim, hidden), dtype=jnp.float32) * 0.1
    b1 = jax.random.normal(k_b1, (1, hidden), dtype=jnp.float32) * 0.1
    w2 = jax.random.normal(k_w2, (hidden, out_dim), dtype=jnp.float32) * 0.1
    b2 = jax.random.normal(k_b2, (1, out_dim), dtype=jnp.float32) * 0.1

    # Weight prep happens ONCE (init / after adapt), not per forward.
    params = prepare_weights(w1, b1, w2, b2)

    out = meta_model_forward(x, params)
    jax.block_until_ready(out)
    assert out.shape == (tasks, batch, out_dim)

    # f32 operands + f32 accumulation in the kernel -> matches the f32
    # reference closely (tolerance leaves margin for MXU f32 rounding paths).
    ref = reference_forward(x.reshape(-1, in_dim), w1, b1, w2, b2)
    ref = ref.reshape(tasks, batch, out_dim)
    assert jnp.allclose(out, ref, atol=5e-3, rtol=5e-3)

    # TODO(synk): copy_weights()/adapt()/set_adapted_weights() are
    # training-time utilities (autograd + in-place parameter copies); only the
    # forward pass is implemented as a kernel.  Per-task adapted (fast)
    # weights would need a task-index scalar prefetch driving the W1/W2
    # index_maps (grouped-GEMM layout); this kernel assumes one shared
    # base_model weight set.
    print("KERNEL_OK")
</pallas_src>

<mosaic_0001>
module attributes {stable_mosaic.version = 11 : i64} {
  func.func @meta_mlp_kernel(%arg0: i32, %arg1: memref<128x32xf32, #tpu.memory_space<vmem>>, %arg2: memref<32x64xf32, #tpu.memory_space<vmem>>, %arg3: memref<1x64xf32, #tpu.memory_space<vmem>>, %arg4: memref<64x16xf32, #tpu.memory_space<vmem>>, %arg5: memref<1x16xf32, #tpu.memory_space<vmem>>, %arg6: memref<128x16xf32, #tpu.memory_space<vmem>>) attributes {dimension_semantics = [#tpu.dimension_semantics<parallel>], iteration_bounds = array<i64: 2>, scalar_prefetch = 0 : i64, scratch_operands = 0 : i64, tpu.core_type = #tpu.core_type<tc>, window_params = [{transform_indices = @transform_0, window_bounds = array<i64: 128, 32>}, {pipeline_mode = #tpu.pipeline_mode<synchronous>, transform_indices = @transform_1, window_bounds = array<i64: 32, 64>}, {pipeline_mode = #tpu.pipeline_mode<synchronous>, transform_indices = @transform_2, window_bounds = array<i64: 1, 64>}, {pipeline_mode = #tpu.pipeline_mode<synchronous>, transform_indices = @transform_3, window_bounds = array<i64: 64, 16>}, {pipeline_mode = #tpu.pipeline_mode<synchronous>, transform_indices = @transform_4, window_bounds = array<i64: 1, 16>}, {transform_indices = @transform_5, window_bounds = array<i64: 128, 16>}]} {
    %c0 = arith.constant 0 : index
    %c0_0 = arith.constant 0 : index
    %0 = vector.load %arg1[%c0, %c0_0] : memref<128x32xf32, #tpu.memory_space<vmem>>, vector<128x32xf32>
    %c0_1 = arith.constant 0 : index
    %c0_2 = arith.constant 0 : index
    %1 = vector.load %arg2[%c0_1, %c0_2] : memref<32x64xf32, #tpu.memory_space<vmem>>, vector<32x64xf32>
    %cst = arith.constant dense<0.000000e+00> : vector<128x64xf32>
    %2 = tpu.matmul %0, %1, %cst {dimension_numbers = #tpu.dot_dimension_numbers<[1], [0], [0], [1], [0, 0, 1, 1], [], []>} : vector<128x32xf32>, vector<32x64xf32>, vector<128x64xf32> -> vector<128x64xf32>
    %c0_3 = arith.constant 0 : index
    %c0_4 = arith.constant 0 : index
    %3 = vector.load %arg3[%c0_3, %c0_4] : memref<1x64xf32, #tpu.memory_space<vmem>>, vector<1x64xf32>
    %4 = vector.broadcast %3 : vector<1x64xf32> to vector<128x64xf32>
    %5 = arith.addf %2, %4 : vector<128x64xf32>
    %cst_5 = arith.constant 0.000000e+00 : f32
    %6 = vector.broadcast %cst_5 : f32 to vector<128x64xf32>
    %7 = arith.maximumf %5, %6 : vector<128x64xf32>
    %c0_6 = arith.constant 0 : index
    %c0_7 = arith.constant 0 : index
    %8 = vector.load %arg4[%c0_6, %c0_7] : memref<64x16xf32, #tpu.memory_space<vmem>>, vector<64x16xf32>
    %cst_8 = arith.constant dense<0.000000e+00> : vector<128x16xf32>
    %9 = tpu.matmul %7, %8, %cst_8 {dimension_numbers = #tpu.dot_dimension_numbers<[1], [0], [0], [1], [0, 0, 1, 1], [], []>} : vector<128x64xf32>, vector<64x16xf32>, vector<128x16xf32> -> vector<128x16xf32>
    %c0_9 = arith.constant 0 : index
    %c0_10 = arith.constant 0 : index
    %10 = vector.load %arg5[%c0_9, %c0_10] : memref<1x16xf32, #tpu.memory_space<vmem>>, vector<1x16xf32>
    %11 = vector.broadcast %10 : vector<1x16xf32> to vector<128x16xf32>
    %12 = arith.addf %9, %11 : vector<128x16xf32>
    %c0_11 = arith.constant 0 : index
    %c0_12 = arith.constant 0 : index
    %13 = vector.load %arg6[%c0_11, %c0_12] : memref<128x16xf32, #tpu.memory_space<vmem>>, vector<128x16xf32>
    tpu.vector_store %arg6[%c0_11, %c0_12], %12 {strides = array<i32>} : memref<128x16xf32, #tpu.memory_space<vmem>>, vector<128x16xf32>,
    return
  }
  func.func @transform_0(%arg0: i32) -> (i32, i32) {
    %c0_i32 = arith.constant 0 : i32
    %c0_i32_0 = arith.constant 0 : i32
    return %arg0, %c0_i32 : i32, i32
  }
  func.func @transform_1(%arg0: i32) -> (i32, i32) {
    %c0_i32 = arith.constant 0 : i32
    %c0_i32_0 = arith.constant 0 : i32
    %c0_i32_1 = arith.constant 0 : i32
    return %c0_i32, %c0_i32_0 : i32, i32
  }
  func.func @transform_2(%arg0: i32) -> (i32, i32) {
    %c0_i32 = arith.constant 0 : i32
    %c0_i32_0 = arith.constant 0 : i32
    %c0_i32_1 = arith.constant 0 : i32
    return %c0_i32, %c0_i32_0 : i32, i32
  }
  func.func @transform_3(%arg0: i32) -> (i32, i32) {
    %c0_i32 = arith.constant 0 : i32
    %c0_i32_0 = arith.constant 0 : i32
    %c0_i32_1 = arith.constant 0 : i32
    return %c0_i32, %c0_i32_0 : i32, i32
  }
  func.func @transform_4(%arg0: i32) -> (i32, i32) {
    %c0_i32 = arith.constant 0 : i32
    %c0_i32_0 = arith.constant 0 : i32
    %c0_i32_1 = arith.constant 0 : i32
    return %c0_i32, %c0_i32_0 : i32, i32
  }
  func.func @transform_5(%arg0: i32) -> (i32, i32) {
    %c0_i32 = arith.constant 0 : i32
    %c0_i32_0 = arith.constant 0 : i32
    return %arg0, %c0_i32 : i32, i32
  }
}

</mosaic_0001>

<bundles_post_ra>
// kernel: tpu_custom_call.1
= control target key start
LH: loop header
LB: loop body
LE: loop exit
PB: predicated region body
PF: predicated region fallthrough
CT: control target
= control target key end

     0   :  { %s684_s18 = smov 0   ;;  %s852_s0 = inlined_call_operand.vmem [shape: f32[256,32], index: 0, kind: input, shape index: {}]   ;;  %s853_s1 = inlined_call_operand.vmem [shape: f32[32,64], index: 1, kind: input, shape index: {}]   ;;  %s854_s2 = inlined_call_operand.vmem [shape: f32[1,64], index: 2, kind: input, shape index: {}]   ;;  %s855_s3 = inlined_call_operand.vmem [shape: f32[64,16], index: 3, kind: input, shape index: {}]   ;;  %s856_s4 = inlined_call_operand.vmem [shape: f32[1,16], index: 4, kind: input, shape index: {}]   ;;  %s857_s5 = inlined_call_operand.vmem [shape: f32[256,16], index: 5, kind: output, shape index: {}]  }
   0x1 LB: > { %s581_s19 = sadd.s32 4294967295, %s652_s18   ;;  %p585_p0 = scmp.ge.s32.totalorder %s652_s18, 1  ;;  %s652_s18 = sphi %s684_s18, %s15_s18  }
   0x2   : > { %p188_p1 = scmp.lt.s32.totalorder %s652_s18, 3 }
   0x4   : > { %p189_p2 = pnand %p585_p0, %p188_p1 }
   0x5   : > { %s586_s24 = sshll.u32 (!%p189_p2), %s581_s19, 4 }
   0x6   : > { %192 = sbr.rel (%p189_p2) target bundleno = 404 (0x194), region = 40  ;;  %p217_p3 = scmp.lt.s32.totalorder (!%p189_p2), %s586_s24, 31 }
   0xb   : > { %v247_v0 = vld [vmem:[%s853_s1 + $0x18] sm:$0xff]  ;;  %v246_v1 = vld [vmem:[%s853_s1 + $0x10] sm:$0xff]  ;;  %v245_v2 = vld [vmem:[%s853_s1 + $0x8] sm:$0xff]  ;;  %s859_s24 = smov (!%p217_p3, %s586_s24), 31  ;;  %vm252_vm0 = vcmask 261120   ;;  %vm394_vm1 = vcmask 523264  }
   0xc   : > { %313 = vmatpush.msra.mxu0 %v247_v0  ;;  %624 = vmatpush.msra.mxu3 %v247_v0  ;;  %v244_v3 = vld [vmem:[%s853_s1] sm:$0xff]  ;;  %s587_s29 = sshll.u32 %s859_s24, 3  ;;  %v389_v14 = vld [vmem:[%s855_s3 + $0x38] sm:$0xff]  ;;  %v388_v15 = vld [vmem:[%s855_s3 + $0x30] sm:$0xff]  ;;  %vm508_vm2 = vcmask 130048  }
   0xd   : > { %s712_s7 = scalar_lea.vmem %s852_s0, %s587_s29  ;;  %451 = vmatpush.msra.mxu1 %v389_v14  ;;  %628 = vmatpush.msra.mxu2 %v389_v14  ;;  %v387_v16 = vld [vmem:[%s855_s3 + $0x28] sm:$0xff]  ;;  %v386_v18 = vld [vmem:[%s855_s3 + $0x20] sm:$0xff]  ;;  %v385_v20 = vld [vmem:[%s855_s3 + $0x18] sm:$0xff]  ;;  %s815_s8 = scalar_lea.vmem %s857_s5, %s587_s29 }
   0xe   : > { %314 = vmatpush.msra.mxu0 %v246_v1  ;;  %625 = vmatpush.msra.mxu3 %v246_v1  ;;  %v228_v4 = vld [vmem:[%s712_s7] sm:$0xff]  ;;  %v229_v5 = vld [vmem:[%s712_s7 + $0x8] sm:$0xff]  ;;  %v230_v6 = vld [vmem:[%s712_s7 + $0x10] sm:$0xff] }
   0xf   : > { %v231_v7 = vld [vmem:[%s712_s7 + $0x18] sm:$0xff]  ;;  %v232_v8 = vld [vmem:[%s712_s7 + $0x20] sm:$0xff]  ;;  %v237_v9 = vld [vmem:[%s712_s7 + $0x48] sm:$0xff]  ;;  %452 = vmatpush.msra.mxu1 %v388_v15  ;;  %629 = vmatpush.msra.mxu2 %v388_v15 }
  0x10   : > { %315 = vmatpush.msra.mxu0 %v245_v2  ;;  %626 = vmatpush.msra.mxu3 %v245_v2  ;;  %v233_v10 = vld [vmem:[%s712_s7 + $0x28] sm:$0xff]  ;;  %v238_v11 = vld [vmem:[%s712_s7 + $0x50] sm:$0xff]  ;;  %v239_v13 = vld [vmem:[%s712_s7 + $0x58] sm:$0xff] }
  0x11   : > { %v234_v12 = vld [vmem:[%s712_s7 + $0x30] sm:$0xff]  ;;  %v235_v17 = vld [vmem:[%s712_s7 + $0x38] sm:$0xff]  ;;  %v240_v19 = vld [vmem:[%s712_s7 + $0x60] sm:$0xff]  ;;  %453 = vmatpush.msra.mxu1 %v387_v16  ;;  %630 = vmatpush.msra.mxu2 %v387_v16 }
  0x12   : > { %316 = vmatpush.msra.mxu0 %v244_v3  ;;  %627 = vmatpush.msra.mxu3 %v244_v3  ;;  %v236_v21 = vld [vmem:[%s712_s7 + $0x40] sm:$0xff]  ;;  %v241_v22 = vld [vmem:[%s712_s7 + $0x68] sm:$0xff]  ;;  %v242_v23 = vld [vmem:[%s712_s7 + $0x70] sm:$0xff] }
  0x13   : > { %590 = vmatmul.msk.f32.vlgmr.msra.gmra.mxu0 %vm252_vm0, %v228_v4  ;;  %599 = vmatmul.msk.f32.vlgmr.msra.gmra.mxu3 %vm252_vm0, %v237_v9  ;;  %v243_v24 = vld [vmem:[%s712_s7 + $0x78] sm:$0xff]  ;;  %v384_v25 = vld [vmem:[%s855_s3 + $0x10] sm:$0xff]  ;;  %v383_v26 = vld [vmem:[%s855_s3 + $0x8] sm:$0xff] }
  0x14   : > { %454 = vmatpush.msra.mxu1 %v386_v18  ;;  %631 = vmatpush.msra.mxu2 %v386_v18  ;;  %v382_v27 = vld [vmem:[%s855_s3] sm:$0xff] }
  0x15   : > { %v773_v28 = vld [vmem:[%s854_s2] ss:$0 sm:$0xff] }
  0x16   : > { %455 = vmatpush.msra.mxu1 %v385_v20  ;;  %632 = vmatpush.msra.mxu2 %v385_v20 }
  0x18   : > { %456 = vmatpush.msra.mxu1 %v384_v25  ;;  %633 = vmatpush.msra.mxu2 %v384_v25 }
  0x1a   : > { %457 = vmatpush.msra.mxu1 %v383_v26  ;;  %634 = vmatpush.msra.mxu2 %v383_v26 }
  0x1b   : > { %591 = vmatmul.msk.f32.gmra.mxu0 %vm252_vm0, %v229_v5  ;;  %600 = vmatmul.msk.f32.gmra.mxu3 %vm252_vm0, %v238_v11 }
  0x1c   : > { %458 = vmatpush.msra.mxu1 %v382_v27  ;;  %635 = vmatpush.msra.mxu2 %v382_v27 }
  0x23   : > { %592 = vmatmul.msk.f32.gmra.mxu0 %vm252_vm0, %v230_v6  ;;  %601 = vmatmul.msk.f32.gmra.mxu3 %vm252_vm0, %v239_v13  ;;  %v645_v13 = vld [vmem:[%s856_s4] ss:$0 sm:$0xff] }
  0x2b   : > { %593 = vmatmul.msk.f32.gmra.mxu0 %vm252_vm0, %v231_v7  ;;  %602 = vmatmul.msk.f32.gmra.mxu3 %vm252_vm0, %v240_v19 }
  0x33   : > { %594 = vmatmul.msk.f32.gmra.mxu0 %vm252_vm0, %v232_v8  ;;  %603 = vmatmul.msk.f32.gmra.mxu3 %vm252_vm0, %v241_v22 }
  0x3b   : > { %595 = vmatmul.msk.f32.gmra.mxu0 %vm252_vm0, %v233_v10  ;;  %604 = vmatmul.msk.f32.gmra.mxu3 %vm252_vm0, %v242_v23 }
  0x43   : > { %596 = vmatmul.msk.f32.gmra.mxu0 %vm252_vm0, %v234_v12  ;;  %605 = vmatmul.msk.f32.gmra.mxu3 %vm252_vm0, %v243_v24 }
  0x4b   : > { %597 = vmatmul.msk.f32.gmra.mxu0 %vm252_vm0, %v235_v17 }
  0x53   : > { %598 = vmatmul.msk.f32.gmra.mxu0 %vm252_vm0, %v236_v21 }
  0x90   : > { %v318_v29 = vpop.f32.mrf.mxu0 }
  0x91   : > { %v319_v30 = vadd.f32 %v773_v28, %v318_v29 }
  0x93   : > { %v366_v31 = vmax.f32 %v319_v30, 0.0 }
  0x95   : > { %606 = vmatmul.msk.f32.vlgmr.msra.gmra.mxu1 %vm394_vm1, %v366_v31 }
  0x96   : > { %v345_v50 = vpop.f32.mrf.mxu3 }
  0x97   : > { %v346_v58 = vadd.f32 %v773_v28, %v345_v50 }
  0x98   : > { %v321_v32 = vpop.f32.mrf.mxu0 }
  0x99   : > { %v322_v33 = vadd.f32 %v773_v28, %v321_v32  ;;  %v375_v59 = vmax.f32 %v346_v58, 0.0 }
  0x9b   : > { %v367_v34 = vmax.f32 %v322_v33, 0.0 }
  0x9d   : > { %607 = vmatmul.msk.f32.gmra.mxu1 %vm394_vm1, %v367_v34 }
  0x9e   : > { %v348_v55 = vpop.f32.mrf.mxu3 }
  0x9f   : > { %v349_v61 = vadd.f32 %v773_v28, %v348_v55 }
  0xa0   : > { %v324_v35 = vpop.f32.mrf.mxu0 }
  0xa1   : > { %v325_v36 = vadd.f32 %v773_v28, %v324_v35  ;;  %v376_v62 = vmax.f32 %v349_v61, 0.0 }
  0xa3   : > { %v368_v37 = vmax.f32 %v325_v36, 0.0 }
  0xa5   : > { %608 = vmatmul.msk.f32.gmra.mxu1 %vm394_vm1, %v368_v37 }
  0xa6   : > { %v351_v60 = vpop.f32.mrf.mxu3 }
  0xa7   : > { %v352_v0 = vadd.f32 %v773_v28, %v351_v60 }
  0xa8   : > { %v327_v38 = vpop.f32.mrf.mxu0 }
  0xa9   : > { %v328_v39 = vadd.f32 %v773_v28, %v327_v38  ;;  %v377_v1 = vmax.f32 %v352_v0, 0.0 }
  0xab   : > { %v369_v40 = vmax.f32 %v328_v39, 0.0 }
  0xad   : > { %609 = vmatmul.msk.f32.gmra.mxu1 %vm394_vm1, %v369_v40 }
  0xae   : > { %v354_v63 = vpop.f32.mrf.mxu3 }
  0xaf   : > { %v355_v2 = vadd.f32 %v773_v28, %v354_v63 }
  0xb0   : > { %v330_v41 = vpop.f32.mrf.mxu0 }
  0xb1   : > { %v331_v42 = vadd.f32 %v773_v28, %v330_v41  ;;  %v378_v4 = vmax.f32 %v355_v2, 0.0 }
  0xb3   : > { %v370_v43 = vmax.f32 %v331_v42, 0.0 }
  0xb5   : > { %610 = vmatmul.msk.f32.gmra.mxu1 %vm394_vm1, %v370_v43 }
  0xb6   : > { %v357_v3 = vpop.f32.mrf.mxu3 }
  0xb7   : > { %v358_v5 = vadd.f32 %v773_v28, %v357_v3 }
  0xb8   : > { %v333_v44 = vpop.f32.mrf.mxu0 }
  0xb9   : > { %v334_v45 = vadd.f32 %v773_v28, %v333_v44  ;;  %v379_v7 = vmax.f32 %v358_v5, 0.0 }
  0xbb   : > { %v371_v46 = vmax.f32 %v334_v45, 0.0 }
  0xbd   : > { %611 = vmatmul.msk.f32.gmra.mxu1 %vm394_vm1, %v371_v46 }
  0xbe   : > { %v360_v6 = vpop.f32.mrf.mxu3 }
  0xbf   : > { %v361_v8 = vadd.f32 %v773_v28, %v360_v6 }
  0xc0   : > { %v336_v47 = vpop.f32.mrf.mxu0 }
  0xc1   : > { %v337_v48 = vadd.f32 %v773_v28, %v336_v47  ;;  %v380_v9 = vmax.f32 %v361_v8, 0.0 }
  0xc3   : > { %v372_v49 = vmax.f32 %v337_v48, 0.0 }
  0xc5   : > { %612 = vmatmul.msk.f32.gmra.mxu1 %vm394_vm1, %v372_v49 }
  0xc6   : > { %v363_v10 = vpop.f32.mrf.mxu3 }
  0xc7   : > { %v364_v11 = vadd.f32 %v773_v28, %v363_v10 }
  0xc8   : > { %v339_v51 = vpop.f32.mrf.mxu0 }
  0xc9   : > { %v340_v52 = vadd.f32 %v773_v28, %v339_v51  ;;  %v381_v12 = vmax.f32 %v364_v11, 0.0 }
  0xcb   : > { %v373_v53 = vmax.f32 %v340_v52, 0.0 }
  0xcd   : > { %613 = vmatmul.msk.f32.gmra.mxu1 %vm394_vm1, %v373_v53 }
  0xd0   : > { %v342_v54 = vpop.f32.mrf.mxu0 }
  0xd1   : > { %v343_v56 = vadd.f32 %v773_v28, %v342_v54 }
  0xd3   : > { %v374_v57 = vmax.f32 %v343_v56, 0.0 }
  0xd5   : > { %614 = vmatmul.msk.f32.vlgmr.msra.gmra.mxu2 %vm394_vm1, %v374_v57 }
  0xdd   : > { %615 = vmatmul.msk.f32.gmra.mxu2 %vm394_vm1, %v375_v59 }
  0xe5   : > { %616 = vmatmul.msk.f32.gmra.mxu2 %vm394_vm1, %v376_v62 }
  0xed   : > { %617 = vmatmul.msk.f32.gmra.mxu2 %vm394_vm1, %v377_v1 }
  0xf5   : > { %618 = vmatmul.msk.f32.gmra.mxu2 %vm394_vm1, %v378_v4 }
  0xfd   : > { %619 = vmatmul.msk.f32.gmra.mxu2 %vm394_vm1, %v379_v7 }
 0x105   : > { %620 = vmatmul.msk.f32.gmra.mxu2 %vm394_vm1, %v380_v9 }
 0x10d   : > { %621 = vmatmul.msk.f32.gmra.mxu2 %vm394_vm1, %v381_v12 }
 0x112   : > { %v460_v14 = vpop.f32.mrf.mxu1 }
 0x113   : > { %v461_v15 = vadd.f32 %v645_v13, %v460_v14 }
 0x115   : > { %509 = vst.msk [vmem:[%s815_s8] sm:$0xff] %vm508_vm2, %v461_v15 }
 0x11a   : > { %v463_v16 = vpop.f32.mrf.mxu1 }
 0x11b   : > { %v464_v17 = vadd.f32 %v645_v13, %v463_v16 }
 0x11d   : > { %510 = vst.msk [vmem:[%s815_s8 + $0x8] sm:$0xff] %vm508_vm2, %v464_v17 }
 0x122   : > { %v466_v18 = vpop.f32.mrf.mxu1 }
 0x123   : > { %v467_v19 = vadd.f32 %v645_v13, %v466_v18 }
 0x125   : > { %511 = vst.msk [vmem:[%s815_s8 + $0x10] sm:$0xff] %vm508_vm2, %v467_v19 }
 0x12a   : > { %v469_v20 = vpop.f32.mrf.mxu1 }
 0x12b   : > { %v470_v21 = vadd.f32 %v645_v13, %v469_v20 }
 0x12d   : > { %512 = vst.msk [vmem:[%s815_s8 + $0x18] sm:$0xff] %vm508_vm2, %v470_v21 }
 0x132   : > { %v472_v22 = vpop.f32.mrf.mxu1 }
 0x133   : > { %v473_v23 = vadd.f32 %v645_v13, %v472_v22 }
 0x135   : > { %513 = vst.msk [vmem:[%s815_s8 + $0x20] sm:$0xff] %vm508_vm2, %v473_v23 }
 0x13a   : > { %v475_v24 = vpop.f32.mrf.mxu1 }
 0x13b   : > { %v476_v25 = vadd.f32 %v645_v13, %v475_v24 }
 0x13d   : > { %514 = vst.msk [vmem:[%s815_s8 + $0x28] sm:$0xff] %vm508_vm2, %v476_v25 }
 0x142   : > { %v478_v26 = vpop.f32.mrf.mxu1 }
 0x143   : > { %v479_v27 = vadd.f32 %v645_v13, %v478_v26 }
 0x145   : > { %515 = vst.msk [vmem:[%s815_s8 + $0x30] sm:$0xff] %vm508_vm2, %v479_v27 }
 0x14a   : > { %v481_v28 = vpop.f32.mrf.mxu1 }
 0x14b   : > { %v482_v29 = vadd.f32 %v645_v13, %v481_v28 }
 0x14d   : > { %516 = vst.msk [vmem:[%s815_s8 + $0x38] sm:$0xff] %vm508_vm2, %v482_v29 }
 0x158   : > { %v484_v30 = vpop.f32.mrf.mxu2 }
 0x159   : > { %v485_v31 = vadd.f32 %v645_v13, %v484_v30 }
 0x15b   : > { %517 = vst.msk [vmem:[%s815_s8 + $0x40] sm:$0xff] %vm508_vm2, %v485_v31 }
 0x160   : > { %v487_v32 = vpop.f32.mrf.mxu2 }
 0x161   : > { %v488_v33 = vadd.f32 %v645_v13, %v487_v32 }
 0x163   : > { %518 = vst.msk [vmem:[%s815_s8 + $0x48] sm:$0xff] %vm508_vm2, %v488_v33 }
 0x168   : > { %v490_v34 = vpop.f32.mrf.mxu2 }
 0x169   : > { %v491_v35 = vadd.f32 %v645_v13, %v490_v34 }
 0x16b   : > { %519 = vst.msk [vmem:[%s815_s8 + $0x50] sm:$0xff] %vm508_vm2, %v491_v35 }
 0x170   : > { %v493_v36 = vpop.f32.mrf.mxu2 }
 0x171   : > { %v494_v37 = vadd.f32 %v645_v13, %v493_v36 }
 0x173   : > { %520 = vst.msk [vmem:[%s815_s8 + $0x58] sm:$0xff] %vm508_vm2, %v494_v37 }
 0x178   : > { %v496_v38 = vpop.f32.mrf.mxu2 }
 0x179   : > { %v497_v39 = vadd.f32 %v645_v13, %v496_v38 }
 0x17b   : > { %521 = vst.msk [vmem:[%s815_s8 + $0x60] sm:$0xff] %vm508_vm2, %v497_v39 }
 0x180   : > { %v499_v40 = vpop.f32.mrf.mxu2 }
 0x181   : > { %v500_v41 = vadd.f32 %v645_v13, %v499_v40 }
 0x183   : > { %522 = vst.msk [vmem:[%s815_s8 + $0x68] sm:$0xff] %vm508_vm2, %v500_v41 }
 0x188   : > { %v502_v42 = vpop.f32.mrf.mxu2 }
 0x189   : > { %v503_v43 = vadd.f32 %v645_v13, %v502_v42 }
 0x18b   : > { %523 = vst.msk [vmem:[%s815_s8 + $0x70] sm:$0xff] %vm508_vm2, %v503_v43 }
 0x190   : > { %v505_v44 = vpop.f32.mrf.mxu2 }
 0x191   : > { %v506_v45 = vadd.f32 %v645_v13, %v505_v44 }
 0x193   : > { %524 = vst.msk [vmem:[%s815_s8 + $0x78] sm:$0xff] %vm508_vm2, %v506_v45 }
 0x194 PF: > { %s15_s18 = sadd.s32 1, %s652_s18  }
 0x195   : > { %p12_p4 = scmp.ge.s32.totalorder %s15_s18, 4  }
 0x197   :  { %14 = sbr.rel (!%p12_p4) target bundleno = 1 (0x1), region = 70 }

</bundles_post_ra>
